<compile_context>
chip_gen: v6e
topology: v6e:2x2x1
jax: 0.10.0
libtpu: 0.0.40
codegen_flags: <defaults>
</compile_context>

<pallas_src>
import functools

import jax
import jax.numpy as jnp
from jax.experimental import pallas as pl
from jax.experimental.pallas import tpu as pltpu


def convlstm_kernel(x_ref, h_ref, c_ref, w_ref, b_ref, h_out_ref, c_out_ref,
                    *, H, W, Cout):
    # Blocks are (1, C, Np); squeeze the batch dim.
    x = x_ref[0]                        # (Cin,  Np)
    h = h_ref[0]                        # (Cout, Np)
    c = c_ref[0]                        # (Cout, Np)

    bottom = jnp.concatenate([x, h], axis=0)        # (Ct, Np)
    Ct, Np = bottom.shape

    # Zero-pad W+1 lanes on each side so each of the 9 conv taps is a static
    # slice of width Np (zero padding also realizes the conv's y-boundary).
    zpad = jnp.zeros((Ct, W + 1), dtype=bottom.dtype)
    padded = jnp.concatenate([zpad, bottom, zpad], axis=1)   # (Ct, Np + 2W + 2)

    # Lane index within each image row; masks the x-boundary of +/-1 column taps.
    col = jax.lax.broadcasted_iota(jnp.int32, (1, Np), 1) % W
    not_left = col != 0
    not_right = col != (W - 1)

    # im2col: stack the 9 shifted taps along the contraction (sublane) axis.
    taps = []
    for ky in range(3):
        for kx in range(3):
            dy, dx = ky - 1, kx - 1
            start = (W + 1) + dy * W + dx
            shifted = padded[:, start:start + Np]            # (Ct, Np)
            if dx == -1:
                shifted = jnp.where(not_left, shifted, 0.0)
            elif dx == 1:
                shifted = jnp.where(not_right, shifted, 0.0)
            taps.append(shifted)
    im2col = jnp.concatenate(taps, axis=0)                   # (9*Ct, Np)

    # Single fused MXU matmul for all 4 gates of the 3x3 conv (+ bias).
    z = jnp.dot(w_ref[...], im2col,
                preferred_element_type=jnp.float32) + b_ref[...]   # (4*Cout, Np)

    i = jax.nn.sigmoid(z[0 * Cout:1 * Cout])
    f = jax.nn.sigmoid(z[1 * Cout:2 * Cout])
    g = jnp.tanh(z[2 * Cout:3 * Cout])
    o = jax.nn.sigmoid(z[3 * Cout:4 * Cout])

    c_new = c * f + i * g
    h_new = o * jnp.tanh(c_new)

    c_out_ref[0] = c_new.astype(c_out_ref.dtype)
    h_out_ref[0] = h_new.astype(h_out_ref.dtype)


@jax.jit
def convlstm_cell(x, h, c, weight, bias):
    """x: (B,Cin,H,W); h,c: (B,Cout,H,W); weight: (4*Cout, Cin+Cout, 3, 3)."""
    B, Cin, H, W = x.shape
    Cout = h.shape[1]
    Ct = Cin + Cout
    N = H * W
    Np = pl.cdiv(N, 128) * 128          # lane-dense (multiple of 128)

    def flat(a):
        a = a.reshape(B, a.shape[1], N)
        if Np != N:
            a = jnp.pad(a, ((0, 0), (0, 0), (0, Np - N)))
        return a

    xf, hf, cf = flat(x), flat(h), flat(c)

    # PyTorch OIHW conv weight -> tap-major (O, (ky,kx,cin)) = (4*Cout, 9*Ct).
    w2 = jnp.transpose(weight, (0, 2, 3, 1)).reshape(4 * Cout, 9 * Ct)
    b2 = bias.reshape(4 * Cout, 1)

    kernel = functools.partial(convlstm_kernel, H=H, W=W, Cout=Cout)

    h_new, c_new = pl.pallas_call(
        kernel,
        out_shape=(jax.ShapeDtypeStruct((B, Cout, Np), x.dtype),
                   jax.ShapeDtypeStruct((B, Cout, Np), x.dtype)),
        grid_spec=pltpu.PrefetchScalarGridSpec(
            num_scalar_prefetch=0,
            grid=(B,),
            in_specs=[
                pl.BlockSpec((1, Cin, Np), lambda b: (b, 0, 0)),    # x
                pl.BlockSpec((1, Cout, Np), lambda b: (b, 0, 0)),   # h
                pl.BlockSpec((1, Cout, Np), lambda b: (b, 0, 0)),   # c
                pl.BlockSpec((4 * Cout, 9 * Ct), lambda b: (0, 0)), # fused conv W
                pl.BlockSpec((4 * Cout, 1), lambda b: (0, 0)),      # bias
            ],
            out_specs=(pl.BlockSpec((1, Cout, Np), lambda b: (b, 0, 0)),
                       pl.BlockSpec((1, Cout, Np), lambda b: (b, 0, 0))),
        ),
        compiler_params=pltpu.CompilerParams(
            dimension_semantics=("parallel",)),
    )(xf, hf, cf, w2, b2)

    h_new = h_new[:, :, :N].reshape(B, Cout, H, W)
    c_new = c_new[:, :, :N].reshape(B, Cout, H, W)
    return h_new, c_new


def convlstm_ref(x, h, c, weight, bias):
    # Pure-JAX reference mirroring the PyTorch forward.
    Cout = h.shape[1]
    bottom = jnp.concatenate([x, h], axis=1)
    z = jax.lax.conv_general_dilated(
        bottom, weight, window_strides=(1, 1), padding=((1, 1), (1, 1)),
        dimension_numbers=("NCHW", "OIHW", "NCHW"))
    z = z + bias[None, :, None, None]
    i, f, g, o = jnp.split(z, 4, axis=1)
    i = jax.nn.sigmoid(i)
    f = jax.nn.sigmoid(f)
    g = jnp.tanh(g)
    o = jax.nn.sigmoid(o)
    c_new = c * f + i * g
    h_new = o * jnp.tanh(c_new)
    return h_new, c_new


if __name__ == "__main__":
    key = jax.random.PRNGKey(0)
    kx, kh, kc, kw, kb = jax.random.split(key, 5)

    B, Cin, Cout, H, W = 2, 4, 8, 16, 16
    Ct = Cin + Cout

    x = jax.random.normal(kx, (B, Cin, H, W), dtype=jnp.float32)
    h = jax.random.normal(kh, (B, Cout, H, W), dtype=jnp.float32)
    c = jax.random.normal(kc, (B, Cout, H, W), dtype=jnp.float32)

    scale = 1.0 / jnp.sqrt(Ct * 9.0)    # PyTorch Conv2d default init range
    weight = jax.random.uniform(kw, (4 * Cout, Ct, 3, 3), jnp.float32, -scale, scale)
    bias = jax.random.uniform(kb, (4 * Cout,), jnp.float32, -scale, scale)

    h_new, c_new = jax.block_until_ready(convlstm_cell(x, h, c, weight, bias))
    h_ref, c_ref = jax.block_until_ready(convlstm_ref(x, h, c, weight, bias))

    assert h_new.shape == (B, Cout, H, W) and c_new.shape == (B, Cout, H, W)
    err_h = jnp.max(jnp.abs(h_new - h_ref))
    err_c = jnp.max(jnp.abs(c_new - c_ref))
    assert jnp.allclose(h_new, h_ref, atol=1e-4, rtol=1e-4), f"h max abs err = {err_h}"
    assert jnp.allclose(c_new, c_ref, atol=1e-4, rtol=1e-4), f"c max abs err = {err_c}"
    print("KERNEL_OK")
</pallas_src>

<mosaic_0001>
module attributes {stable_mosaic.version = 11 : i64} {
  func.func @convlstm_kernel(%arg0: i32, %arg1: memref<1x4x256xf32, #tpu.memory_space<vmem>>, %arg2: memref<1x8x256xf32, #tpu.memory_space<vmem>>, %arg3: memref<1x8x256xf32, #tpu.memory_space<vmem>>, %arg4: memref<32x108xf32, #tpu.memory_space<vmem>>, %arg5: memref<32x1xf32, #tpu.memory_space<vmem>>, %arg6: memref<1x8x256xf32, #tpu.memory_space<vmem>>, %arg7: memref<1x8x256xf32, #tpu.memory_space<vmem>>) attributes {dimension_semantics = [#tpu.dimension_semantics<parallel>], iteration_bounds = array<i64: 2>, scalar_prefetch = 0 : i64, scratch_operands = 0 : i64, tpu.core_type = #tpu.core_type<tc>, window_params = [{transform_indices = @transform_0, window_bounds = array<i64: 1, 4, 256>}, {transform_indices = @transform_1, window_bounds = array<i64: 1, 8, 256>}, {transform_indices = @transform_2, window_bounds = array<i64: 1, 8, 256>}, {pipeline_mode = #tpu.pipeline_mode<synchronous>, transform_indices = @transform_3, window_bounds = array<i64: 32, 108>}, {pipeline_mode = #tpu.pipeline_mode<synchronous>, transform_indices = @transform_4, window_bounds = array<i64: 32, 1>}, {transform_indices = @transform_5, window_bounds = array<i64: 1, 8, 256>}, {transform_indices = @transform_6, window_bounds = array<i64: 1, 8, 256>}]} {
    %c0 = arith.constant 0 : index
    %c0_0 = arith.constant 0 : index
    %c0_1 = arith.constant 0 : index
    %0 = vector.load %arg1[%c0, %c0_0, %c0_1] : memref<1x4x256xf32, #tpu.memory_space<vmem>>, vector<1x4x256xf32>
    %1 = vector.shape_cast %0 : vector<1x4x256xf32> to vector<4x256xf32>
    %c0_2 = arith.constant 0 : index
    %c0_3 = arith.constant 0 : index
    %c0_4 = arith.constant 0 : index
    %2 = vector.load %arg2[%c0_2, %c0_3, %c0_4] : memref<1x8x256xf32, #tpu.memory_space<vmem>>, vector<1x8x256xf32>
    %3 = vector.shape_cast %2 : vector<1x8x256xf32> to vector<8x256xf32>
    %c0_5 = arith.constant 0 : index
    %c0_6 = arith.constant 0 : index
    %c0_7 = arith.constant 0 : index
    %4 = vector.load %arg3[%c0_5, %c0_6, %c0_7] : memref<1x8x256xf32, #tpu.memory_space<vmem>>, vector<1x8x256xf32>
    %5 = vector.shape_cast %4 : vector<1x8x256xf32> to vector<8x256xf32>
    %6 = tpu.concatenate %1, %3 in 0 : vector<4x256xf32>, vector<8x256xf32> -> vector<12x256xf32>
    %cst = arith.constant 0.000000e+00 : f32
    %7 = vector.broadcast %cst : f32 to vector<12x17xf32>
    %8 = tpu.concatenate %7, %6, %7 in 1 : vector<12x17xf32>, vector<12x256xf32>, vector<12x17xf32> -> vector<12x290xf32>
    %9 = tpu.iota {dimensions = array<i32: 1>} : vector<1x256xi32>
    %c16_i32 = arith.constant 16 : i32
    %c0_i32 = arith.constant 0 : i32
    %10 = arith.cmpi eq, %c16_i32, %c0_i32 : i32
    %c1_i32 = arith.constant 1 : i32
    %11 = arith.select %10, %c1_i32, %c16_i32 : i32
    %12 = vector.broadcast %11 : i32 to vector<1x256xi32>
    %13 = arith.remsi %9, %12 : vector<1x256xi32>
    %c0_i32_8 = arith.constant 0 : i32
    %14 = vector.broadcast %c0_i32_8 : i32 to vector<1x256xi32>
    %15 = arith.cmpi ne, %13, %14 : vector<1x256xi32>
    %c0_i32_9 = arith.constant 0 : i32
    %16 = vector.broadcast %c0_i32_9 : i32 to vector<1x256xi32>
    %17 = arith.cmpi slt, %13, %16 : vector<1x256xi32>
    %c0_i32_10 = arith.constant 0 : i32
    %18 = arith.cmpi slt, %11, %c0_i32_10 : i32
    %19 = vector.broadcast %18 : i1 to vector<1x256xi1>
    %20 = vector.broadcast %19 : vector<1x256xi1> to vector<1x256xi1>
    %21 = arith.xori %17, %20 : vector<1x256xi1>
    %22 = arith.andi %21, %15 : vector<1x256xi1>
    %23 = vector.broadcast %11 : i32 to vector<1x256xi32>
    %24 = arith.addi %13, %23 : vector<1x256xi32>
    %25 = arith.select %22, %24, %13 : vector<1x256xi1>, vector<1x256xi32>
    %c0_i32_11 = arith.constant 0 : i32
    %26 = vector.broadcast %c0_i32_11 : i32 to vector<1x256xi32>
    %27 = arith.cmpi ne, %25, %26 : vector<1x256xi32>
    %c15_i32 = arith.constant 15 : i32
    %28 = vector.broadcast %c15_i32 : i32 to vector<1x256xi32>
    %29 = arith.cmpi ne, %25, %28 : vector<1x256xi32>
    %30 = vector.extract_strided_slice %8 {offsets = [0, 0], sizes = [12, 256], strides = [1, 1]} : vector<12x290xf32> to vector<12x256xf32>
    %cst_12 = arith.constant 0.000000e+00 : f32
    %31 = vector.shape_cast %27 : vector<1x256xi1> to vector<1x256xi1>
    %32 = vector.broadcast %31 : vector<1x256xi1> to vector<12x256xi1>
    %33 = vector.broadcast %cst_12 : f32 to vector<12x256xf32>
    %34 = arith.select %32, %30, %33 : vector<12x256xi1>, vector<12x256xf32>
    %35 = vector.extract_strided_slice %8 {offsets = [0, 1], sizes = [12, 256], strides = [1, 1]} : vector<12x290xf32> to vector<12x256xf32>
    %36 = vector.extract_strided_slice %8 {offsets = [0, 2], sizes = [12, 256], strides = [1, 1]} : vector<12x290xf32> to vector<12x256xf32>
    %cst_13 = arith.constant 0.000000e+00 : f32
    %37 = vector.shape_cast %29 : vector<1x256xi1> to vector<1x256xi1>
    %38 = vector.broadcast %37 : vector<1x256xi1> to vector<12x256xi1>
    %39 = vector.broadcast %cst_13 : f32 to vector<12x256xf32>
    %40 = arith.select %38, %36, %39 : vector<12x256xi1>, vector<12x256xf32>
    %41 = vector.extract_strided_slice %8 {offsets = [0, 16], sizes = [12, 256], strides = [1, 1]} : vector<12x290xf32> to vector<12x256xf32>
    %cst_14 = arith.constant 0.000000e+00 : f32
    %42 = vector.shape_cast %27 : vector<1x256xi1> to vector<1x256xi1>
    %43 = vector.broadcast %42 : vector<1x256xi1> to vector<12x256xi1>
    %44 = vector.broadcast %cst_14 : f32 to vector<12x256xf32>
    %45 = arith.select %43, %41, %44 : vector<12x256xi1>, vector<12x256xf32>
    %46 = vector.extract_strided_slice %8 {offsets = [0, 17], sizes = [12, 256], strides = [1, 1]} : vector<12x290xf32> to vector<12x256xf32>
    %47 = vector.extract_strided_slice %8 {offsets = [0, 18], sizes = [12, 256], strides = [1, 1]} : vector<12x290xf32> to vector<12x256xf32>
    %cst_15 = arith.constant 0.000000e+00 : f32
    %48 = vector.shape_cast %29 : vector<1x256xi1> to vector<1x256xi1>
    %49 = vector.broadcast %48 : vector<1x256xi1> to vector<12x256xi1>
    %50 = vector.broadcast %cst_15 : f32 to vector<12x256xf32>
    %51 = arith.select %49, %47, %50 : vector<12x256xi1>, vector<12x256xf32>
    %52 = vector.extract_strided_slice %8 {offsets = [0, 32], sizes = [12, 256], strides = [1, 1]} : vector<12x290xf32> to vector<12x256xf32>
    %cst_16 = arith.constant 0.000000e+00 : f32
    %53 = vector.shape_cast %27 : vector<1x256xi1> to vector<1x256xi1>
    %54 = vector.broadcast %53 : vector<1x256xi1> to vector<12x256xi1>
    %55 = vector.broadcast %cst_16 : f32 to vector<12x256xf32>
    %56 = arith.select %54, %52, %55 : vector<12x256xi1>, vector<12x256xf32>
    %57 = vector.extract_strided_slice %8 {offsets = [0, 33], sizes = [12, 256], strides = [1, 1]} : vector<12x290xf32> to vector<12x256xf32>
    %58 = vector.extract_strided_slice %8 {offsets = [0, 34], sizes = [12, 256], strides = [1, 1]} : vector<12x290xf32> to vector<12x256xf32>
    %cst_17 = arith.constant 0.000000e+00 : f32
    %59 = vector.shape_cast %29 : vector<1x256xi1> to vector<1x256xi1>
    %60 = vector.broadcast %59 : vector<1x256xi1> to vector<12x256xi1>
    %61 = vector.broadcast %cst_17 : f32 to vector<12x256xf32>
    %62 = arith.select %60, %58, %61 : vector<12x256xi1>, vector<12x256xf32>
    %63 = tpu.concatenate %34, %35, %40, %45, %46, %51, %56, %57, %62 in 0 : vector<12x256xf32>, vector<12x256xf32>, vector<12x256xf32>, vector<12x256xf32>, vector<12x256xf32>, vector<12x256xf32>, vector<12x256xf32>, vector<12x256xf32>, vector<12x256xf32> -> vector<108x256xf32>
    %c0_18 = arith.constant 0 : index
    %c0_19 = arith.constant 0 : index
    %64 = vector.load %arg4[%c0_18, %c0_19] : memref<32x108xf32, #tpu.memory_space<vmem>>, vector<32x108xf32>
    %cst_20 = arith.constant dense<0.000000e+00> : vector<32x256xf32>
    %65 = tpu.matmul %64, %63, %cst_20 {dimension_numbers = #tpu.dot_dimension_numbers<[1], [0], [0], [1], [0, 0, 1, 1], [], []>} : vector<32x108xf32>, vector<108x256xf32>, vector<32x256xf32> -> vector<32x256xf32>
    %c0_21 = arith.constant 0 : index
    %c0_22 = arith.constant 0 : index
    %66 = vector.load %arg5[%c0_21, %c0_22] : memref<32x1xf32, #tpu.memory_space<vmem>>, vector<32x1xf32>
    %67 = vector.broadcast %66 : vector<32x1xf32> to vector<32x256xf32>
    %68 = arith.addf %65, %67 : vector<32x256xf32>
    %69 = vector.extract_strided_slice %68 {offsets = [0, 0], sizes = [8, 256], strides = [1, 1]} : vector<32x256xf32> to vector<8x256xf32>
    %70 = arith.negf %69 : vector<8x256xf32>
    %71 = math.exp %70 : vector<8x256xf32>
    %cst_23 = arith.constant 1.000000e+00 : f32
    %72 = vector.broadcast %cst_23 : f32 to vector<8x256xf32>
    %73 = arith.addf %72, %71 : vector<8x256xf32>
    %74 = arith.divf %72, %73 : vector<8x256xf32>
    %75 = vector.extract_strided_slice %68 {offsets = [8, 0], sizes = [8, 256], strides = [1, 1]} : vector<32x256xf32> to vector<8x256xf32>
    %76 = arith.negf %75 : vector<8x256xf32>
    %77 = math.exp %76 : vector<8x256xf32>
    %cst_24 = arith.constant 1.000000e+00 : f32
    %78 = vector.broadcast %cst_24 : f32 to vector<8x256xf32>
    %79 = arith.addf %78, %77 : vector<8x256xf32>
    %80 = arith.divf %78, %79 : vector<8x256xf32>
    %81 = vector.extract_strided_slice %68 {offsets = [16, 0], sizes = [8, 256], strides = [1, 1]} : vector<32x256xf32> to vector<8x256xf32>
    %82 = math.tanh %81 : vector<8x256xf32>
    %83 = vector.extract_strided_slice %68 {offsets = [24, 0], sizes = [8, 256], strides = [1, 1]} : vector<32x256xf32> to vector<8x256xf32>
    %84 = arith.negf %83 : vector<8x256xf32>
    %85 = math.exp %84 : vector<8x256xf32>
    %cst_25 = arith.constant 1.000000e+00 : f32
    %86 = vector.broadcast %cst_25 : f32 to vector<8x256xf32>
    %87 = arith.addf %86, %85 : vector<8x256xf32>
    %88 = arith.divf %86, %87 : vector<8x256xf32>
    %89 = arith.mulf %5, %80 : vector<8x256xf32>
    %90 = arith.mulf %74, %82 : vector<8x256xf32>
    %91 = arith.addf %89, %90 : vector<8x256xf32>
    %92 = math.tanh %91 : vector<8x256xf32>
    %93 = arith.mulf %88, %92 : vector<8x256xf32>
    %c0_26 = arith.constant 0 : index
    %c0_27 = arith.constant 0 : index
    %c0_28 = arith.constant 0 : index
    %94 = vector.load %arg7[%c0_26, %c0_27, %c0_28] : memref<1x8x256xf32, #tpu.memory_space<vmem>>, vector<1x8x256xf32>
    %95 = vector.shape_cast %94 : vector<1x8x256xf32> to vector<8x256xf32>
    %96 = vector.shape_cast %91 : vector<8x256xf32> to vector<1x8x256xf32>
    tpu.vector_store %arg7[%c0_26, %c0_27, %c0_28], %96 {strides = array<i32>} : memref<1x8x256xf32, #tpu.memory_space<vmem>>, vector<1x8x256xf32>,
    %c0_29 = arith.constant 0 : index
    %c0_30 = arith.constant 0 : index
    %c0_31 = arith.constant 0 : index
    %97 = vector.load %arg6[%c0_29, %c0_30, %c0_31] : memref<1x8x256xf32, #tpu.memory_space<vmem>>, vector<1x8x256xf32>
    %98 = vector.shape_cast %97 : vector<1x8x256xf32> to vector<8x256xf32>
    %99 = vector.shape_cast %93 : vector<8x256xf32> to vector<1x8x256xf32>
    tpu.vector_store %arg6[%c0_29, %c0_30, %c0_31], %99 {strides = array<i32>} : memref<1x8x256xf32, #tpu.memory_space<vmem>>, vector<1x8x256xf32>,
    return
  }
  func.func @transform_0(%arg0: i32) -> (i32, i32, i32) {
    %c0_i32 = arith.constant 0 : i32
    %c0_i32_0 = arith.constant 0 : i32
    %c0_i32_1 = arith.constant 0 : i32
    return %arg0, %c0_i32, %c0_i32_0 : i32, i32, i32
  }
  func.func @transform_1(%arg0: i32) -> (i32, i32, i32) {
    %c0_i32 = arith.constant 0 : i32
    %c0_i32_0 = arith.constant 0 : i32
    %c0_i32_1 = arith.constant 0 : i32
    return %arg0, %c0_i32, %c0_i32_0 : i32, i32, i32
  }
  func.func @transform_2(%arg0: i32) -> (i32, i32, i32) {
    %c0_i32 = arith.constant 0 : i32
    %c0_i32_0 = arith.constant 0 : i32
    %c0_i32_1 = arith.constant 0 : i32
    return %arg0, %c0_i32, %c0_i32_0 : i32, i32, i32
  }
  func.func @transform_3(%arg0: i32) -> (i32, i32) {
    %c0_i32 = arith.constant 0 : i32
    %c0_i32_0 = arith.constant 0 : i32
    %c0_i32_1 = arith.constant 0 : i32
    return %c0_i32, %c0_i32_0 : i32, i32
  }
  func.func @transform_4(%arg0: i32) -> (i32, i32) {
    %c0_i32 = arith.constant 0 : i32
    %c0_i32_0 = arith.constant 0 : i32
    %c0_i32_1 = arith.constant 0 : i32
    return %c0_i32, %c0_i32_0 : i32, i32
  }
  func.func @transform_5(%arg0: i32) -> (i32, i32, i32) {
    %c0_i32 = arith.constant 0 : i32
    %c0_i32_0 = arith.constant 0 : i32
    %c0_i32_1 = arith.constant 0 : i32
    return %arg0, %c0_i32, %c0_i32_0 : i32, i32, i32
  }
  func.func @transform_6(%arg0: i32) -> (i32, i32, i32) {
    %c0_i32 = arith.constant 0 : i32
    %c0_i32_0 = arith.constant 0 : i32
    %c0_i32_1 = arith.constant 0 : i32
    return %arg0, %c0_i32, %c0_i32_0 : i32, i32, i32
  }
}

</mosaic_0001>

<bundles_post_ra>
// kernel: convlstm_cell.1
= control target key start
LH: loop header
LB: loop body
LE: loop exit
PB: predicated region body
PF: predicated region fallthrough
CT: control target
= control target key end

     0   :  { %s1103_s21 = smov 0   ;;  %s1422_s0 = inlined_call_operand.vmem [shape: f32[2,4,256], index: 0, kind: input, shape index: {}]   ;;  %s1423_s1 = inlined_call_operand.vmem [shape: f32[2,8,256], index: 1, kind: input, shape index: {}]   ;;  %s1424_s2 = inlined_call_operand.vmem [shape: f32[2,8,256], index: 2, kind: input, shape index: {}]   ;;  %s1425_s3 = inlined_call_operand.vmem [shape: f32[32,108], index: 3, kind: input, shape index: {}]   ;;  %s1426_s4 = inlined_call_operand.vmem [shape: f32[32,1], index: 4, kind: input, shape index: {}]   ;;  %s1427_s5 = inlined_call_operand.vmem [shape: f32[2,8,256], index: 5, kind: output, shape index: {0}]   ;;  %s1428_s6 = inlined_call_operand.vmem [shape: f32[2,8,256], index: 6, kind: output, shape index: {1}]  }
   0x1 LB: > { %s925_s22 = sadd.s32 4294967295, %s1055_s21   ;;  %p929_p0 = scmp.ge.s32.totalorder %s1055_s21, 1  ;;  %s1055_s21 = sphi %s1103_s21, %s17_s21  }
   0x2   : > { %p235_p1 = scmp.lt.s32.totalorder %s1055_s21, 3 }
   0x4   : > { %p236_p2 = pnand %p929_p0, %p235_p1 }
   0x5   : > { %p280_p3 = scmp.lt.s32.totalorder (!%p236_p2), %s925_s22, 1  ;;  %s1057_s7 = smov (!%p236_p2), 17  }
   0x6   : > { %239 = sbr.rel (%p236_p2) target bundleno = 604 (0x25c), region = 40  ;;  %s1058_s8 = smov (!%p236_p2), 94  }
   0x7   : > { %s1059_s9 = smov (!%p236_p2), 96   ;;  %s1060_s10 = smov (!%p236_p2), 110  }
   0x8   : > { %s1061_s11 = smov (!%p236_p2), 111   ;;  %s1062_s12 = smov (!%p236_p2), 112  }
   0x9   : > { %s1063_s13 = smov (!%p236_p2), 126   ;;  %s1064_s14 = smov (!%p236_p2), 95  }
   0xa   : > { %s1065_s15 = smov (!%p236_p2), 127  }
   0xb   : > { %s1438_s22 = smov (!%p280_p3, %s925_s22), 1  ;;  %vm319_vm0 = vcmask 1043456   ;;  %vm332_vm1 = vcmask 138240   ;;  %v1066_v27 = vmov 0.0   ;;  %v1067_v28 = vmov 0   ;;  %v629_v29 = vld [vmem:[%s1426_s4] sm:$0xff] }
   0xc   : > { %s1111_s23 = sshll.u32 %s1438_s22, 4  ;;  %s962_s24 = sshll.u32 %s1438_s22, 3  ;;  %736 = vmatprep.mubr.f32.mxu0 %v1066_v27  ;;  %748 = vmatprep.mubr.f32.mxu1 %v1066_v27  ;;  %v630_v30 = vld [vmem:[%s1426_s4 + $0x8] sm:$0xff]  ;;  %v631_v31 = vld [vmem:[%s1426_s4 + $0x10] sm:$0xff]  ;;  %v632_v32 = vld [vmem:[%s1426_s4 + $0x18] sm:$0xff]  ;;  %v345_v33 = vlaneseq  ;;  %vm504_vm2 = vcmask 769024  }
   0xd   : > { %s289_s27 = scalar_lea.vmem %s1423_s1, %s1111_s23  ;;  %s284_s30 = scalar_lea.vmem %s1422_s0, %s962_s24  ;;  %1014 = vset.pattern.permute.xlu0 %v1067_v28  ;;  %1015 = vset.pattern.permute.xlu1 %v1067_v28  ;;  %vm479_vm5 = vcmask 785408   ;;  %vm454_vm6 = vcmask 900096   ;;  %vm608_vm7 = vcmask 777216   ;;  %vm429_vm10 = vcmask 916480  }
   0xe   : > { %v306_v0 = vld [vmem:[%s289_s27] sm:$0xff]  ;;  %v307_v1 = vld [vmem:[%s289_s27 + $0x8] sm:$0xff]  ;;  %v1205_v34 = vand.u32 127, %v345_v33  ;;  %vm573_vm11 = vcmask 908288   ;;  %vm404_vm12 = vcmask 1031168   ;;  %vm538_vm13 = vcmask 1039360   ;;  %s299_s18 = scalar_lea.vmem %s1427_s5, %s1111_s23 }
   0xf   : > { %v315_v2 = vrot.slane %v306_v0, 4  ;;  %v316_v3 = vrot.slane %v307_v1, 4  ;;  %v305_v4 = vld [vmem:[%s284_s30] sm:$0xff]  ;;  %vm653_vm14 = vcmask 883712  }
  0x10   : > { %v311_v6 = vcombine.high %v305_v4, %v305_v4  ;;  %v1208_v35 = vadd.s32 128, %v1205_v34  ;;  %v352_v41 = vand.u32 15, %v1205_v34 }
  0x11   : > { %328 = vrot.lane.b32.xlu0 %v315_v2, %s1057_s7  ;;  %v320_v5 = vsel %vm319_vm0, %v305_v4, %v315_v2 }
  0x12   : > { %324 = vrot.lane.b32.xlu1 %v320_v5, %s1057_s7  ;;  %v321_v7 = vsel %vm319_vm0, %v311_v6, %v316_v3  ;;  %v359_v36 = vand.u32 15, %v1208_v35  ;;  %vm1223_vm4 = vcmp.ne.s32.totalorder %v352_v41, 15  ;;  %vm1271_vm8 = vcmp.ne.s32.totalorder %v352_v41, 0 }
  0x14   : > { %vm1213_vm3 = vcmp.ne.s32.totalorder %v359_v36, 15  ;;  %vm1278_vm9 = vcmp.ne.s32.totalorder %v359_v36, 0 }
  0x15   : > { %330 = vrot.lane.b32.xlu0 %v316_v3, %s1057_s7 }
  0x16   : > { %326 = vrot.lane.b32.xlu1 %v321_v7, %s1057_s7 }
  0x83   : > { %v329_v8 = vpop.permute.xlu0 %328 }
  0x84   : > { %v1130_v12 = vsel %vm332_vm1, 0.0, %v329_v8  ;;  %v325_v13 = vpop.permute.xlu1 %324 }
  0x85   : > { %v1151_v16 = vsel %vm332_vm1, 0.0, %v325_v13  ;;  %v520_v23 = vrot.slane %v1130_v12, 4 }
  0x86   : > { %v517_v21 = vrot.slane %v1151_v16, 4 }
  0x87   : > { %v331_v9 = vpop.permute.xlu0 %330 }
  0x88   : > { %v1123_v10 = vsel %vm332_vm1, %v329_v8, %v331_v9  ;;  %v344_v11 = vsel %vm332_vm1, %v331_v9, 0.0  ;;  %v327_v14 = vpop.permute.xlu1 %326  ;;  %v521_v25 = vsel %vm319_vm0, %v517_v21, %v520_v23 }
  0x89   : > { %500 = vrot.lane.b32.xlu0 %v1123_v10, %s1058_s8  ;;  %502 = vrot.lane.b32.xlu1 %v344_v11, %s1058_s8  ;;  %v1144_v15 = vsel %vm332_vm1, %v325_v13, %v327_v14  ;;  %v343_v17 = vsel %vm332_vm1, %v327_v14, 0.0  ;;  %v524_v20 = vrot.slane %v344_v11, 4  ;;  %v522_v24 = vrot.slane %v1123_v10, 4 }
  0x8a   : > { %v519_v18 = vrot.slane %v343_v17, 4  ;;  %v518_v19 = vrot.slane %v1144_v15, 4  ;;  %v383_v37 = vsel %vm1278_vm9, %v1123_v10, 0.0 }
  0x8c   : > { %v525_v22 = vsel %vm319_vm0, %v519_v18, %v524_v20  ;;  %v523_v26 = vsel %vm319_vm0, %v518_v19, %v522_v24 }
  0x8d   : > { %498 = vrot.lane.b32.xlu0 %v1130_v12, %s1058_s8  ;;  %477 = vrot.lane.b32.xlu1 %v344_v11, %s1059_s9 }
  0x91   : > { %475 = vrot.lane.b32.xlu0 %v1123_v10, %s1059_s9  ;;  %452 = vrot.lane.b32.xlu1 %v344_v11, %s1060_s10 }
  0x95   : > { %473 = vrot.lane.b32.xlu0 %v1130_v12, %s1059_s9  ;;  %571 = vrot.lane.b32.xlu1 %v344_v11, %s1061_s11 }
  0x99   : > { %450 = vrot.lane.b32.xlu0 %v1123_v10, %s1060_s10  ;;  %427 = vrot.lane.b32.xlu1 %v344_v11, %s1062_s12 }
  0x9d   : > { %448 = vrot.lane.b32.xlu0 %v1130_v12, %s1060_s10  ;;  %402 = vrot.lane.b32.xlu1 %v344_v11, %s1063_s13 }
  0xa1   : > { %569 = vrot.lane.b32.xlu0 %v1123_v10, %s1061_s11  ;;  %494 = vrot.lane.b32.xlu1 %v1144_v15, %s1058_s8 }
  0xa5   : > { %425 = vrot.lane.b32.xlu0 %v1123_v10, %s1062_s12  ;;  %492 = vrot.lane.b32.xlu1 %v1151_v16, %s1058_s8 }
  0xa9   : > { %567 = vrot.lane.b32.xlu0 %v1130_v12, %s1061_s11  ;;  %446 = vrot.lane.b32.xlu1 %v343_v17, %s1060_s10 }
  0xad   : > { %423 = vrot.lane.b32.xlu0 %v1130_v12, %s1062_s12  ;;  %442 = vrot.lane.b32.xlu1 %v1151_v16, %s1060_s10 }
  0xb1   : > { %400 = vrot.lane.b32.xlu0 %v1123_v10, %s1063_s13  ;;  %469 = vrot.lane.b32.xlu1 %v1144_v15, %s1059_s9  ;;  %v627_v10 = vld [vmem:[%s1425_s3 + $0x10] sm:$0xff] }
  0xb5   : > { %496 = vrot.lane.b32.xlu0 %v343_v17, %s1058_s8  ;;  %467 = vrot.lane.b32.xlu1 %v1151_v16, %s1059_s9 }
  0xb9   : > { %444 = vrot.lane.b32.xlu0 %v1144_v15, %s1060_s10  ;;  %421 = vrot.lane.b32.xlu1 %v343_v17, %s1062_s12 }
  0xbd   : > { %471 = vrot.lane.b32.xlu0 %v343_v17, %s1059_s9  ;;  %417 = vrot.lane.b32.xlu1 %v1151_v16, %s1062_s12 }
  0xc1   : > { %419 = vrot.lane.b32.xlu0 %v1144_v15, %s1062_s12  ;;  %563 = vrot.lane.b32.xlu1 %v1144_v15, %s1061_s11  ;;  %s294_s12 = scalar_lea.vmem %s1424_s2, %s1111_s23 }
  0xc5   : > { %565 = vrot.lane.b32.xlu0 %v343_v17, %s1061_s11  ;;  %561 = vrot.lane.b32.xlu1 %v1151_v16, %s1061_s11 }
  0xc9   : > { %600 = vrot.lane.b32.xlu0 %v519_v18, %s1064_s14  ;;  %598 = vrot.lane.b32.xlu1 %v518_v19, %s1064_s14 }
  0xcd   : > { %596 = vrot.lane.b32.xlu0 %v517_v21, %s1064_s14  ;;  %606 = vrot.lane.b32.xlu1 %v525_v22, %s1064_s14 }
  0xd1   : > { %602 = vrot.lane.b32.xlu1 %v521_v25, %s1064_s14  ;;  %604 = vrot.lane.b32.xlu0 %v523_v26, %s1064_s14 }
  0xd5   : > { %394 = vrot.lane.b32.xlu1 %v1144_v15, %s1063_s13  ;;  %398 = vrot.lane.b32.xlu0 %v1130_v12, %s1063_s13 }
  0xd9   : > { %392 = vrot.lane.b32.xlu1 %v1151_v16, %s1063_s13  ;;  %396 = vrot.lane.b32.xlu0 %v343_v17, %s1063_s13 }
  0xdd   : > { %530 = vrot.lane.b32.xlu1 %v519_v18, %s1065_s15  ;;  %528 = vrot.lane.b32.xlu0 %v518_v19, %s1065_s15 }
  0xe1   : > { %536 = vrot.lane.b32.xlu1 %v525_v22, %s1065_s15  ;;  %534 = vrot.lane.b32.xlu0 %v523_v26, %s1065_s15 }
  0xe5   : > { %526 = vrot.lane.b32.xlu1 %v517_v21, %s1065_s15  ;;  %532 = vrot.lane.b32.xlu0 %v521_v25, %s1065_s15  ;;  %s304_s15 = scalar_lea.vmem %s1428_s6, %s1111_s23 }
  0xe9   : > { %635 = vperm.xlu0 %1014, %v629_v29   ;;  %640 = vperm.xlu1 %1015, %v630_v30  }
  0xed   : > { %645 = vperm.xlu1 %1015, %v631_v31   ;;  %650 = vperm.xlu0 %1014, %v632_v32  }
  0xfb   : > { %v501_v38 = vpop.permute.xlu0 %500  ;;  %v503_v39 = vpop.permute.xlu1 %502 }
  0xfc   : > { %v508_v40 = vsel %vm504_vm2, %v501_v38, %v503_v39 }
  0xfd   : > { %v516_v42 = vsel %vm1213_vm3, %v508_v40, 0.0 }
  0xfe   : > { %940 = vmatprep.subr.msk.mxu0 %vm319_vm0, %v516_v42  ;;  %967 = vmatprep.subr.msk.mxu1 %vm319_vm0, %v516_v42 }
  0xff   : > { %v499_v44 = vpop.permute.xlu0 %498  ;;  %v478_v45 = vpop.permute.xlu1 %477 }
 0x100   : > { %v507_v46 = vsel %vm504_vm2, %v499_v44, %v501_v38 }
 0x101   : > { %v515_v47 = vsel %vm1223_vm4, %v507_v46, 0.0 }
 0x102   : > { %941 = vmatpush1.msk.msra.mxu0 %vm319_vm0, %v515_v47  ;;  %981 = vmatpush1.msk.msra.mxu1 %vm319_vm0, %v515_v47 }
 0x103   : > { %v476_v48 = vpop.permute.xlu0 %475  ;;  %v453_v49 = vpop.permute.xlu1 %452 }
 0x104   : > { %v1233_v50 = vsel %vm479_vm5, %v476_v48, %v478_v45 }
 0x105   : > { %v491_v35 = vsel %vm1278_vm9, %v1233_v50, 0.0 }
 0x107   : > { %v474_v51 = vpop.permute.xlu0 %473  ;;  %v1235_v52 = vpop.permute.xlu1 %571 }
 0x108   : > { %v482_v26 = vsel %vm479_vm5, %v474_v51, %v476_v48 }
 0x109   : > { %v490_v36 = vsel %vm1271_vm8, %v482_v26, 0.0 }
 0x10b   : > { %v451_v53 = vpop.permute.xlu0 %450  ;;  %v1237_v54 = vpop.permute.xlu1 %427 }
 0x10c   : > { %v458_v28 = vsel %vm454_vm6, %v451_v53, %v453_v49 }
 0x10d   : > { %v466_v42 = vsel %vm1213_vm3, %v458_v28, 0.0 }
 0x10f   : > { %v449_v55 = vpop.permute.xlu0 %448  ;;  %v1239_v56 = vpop.permute.xlu1 %402 }
 0x110   : > { %v457_v30 = vsel %vm454_vm6, %v449_v55, %v451_v53  ;;  %v590_v55 = vrot.slane %v466_v42, 4 }
 0x111   : > { %v465_v44 = vsel %vm1223_vm4, %v457_v30, 0.0 }
 0x113   : > { %v1241_v57 = vpop.permute.xlu0 %569  ;;  %v495_v58 = vpop.permute.xlu1 %494 }
 0x117   : > { %v1243_v59 = vpop.permute.xlu0 %425  ;;  %v493_v60 = vpop.permute.xlu1 %492 }
 0x118   : > { %v505_v6 = vsel %vm504_vm2, %v493_v60, %v495_v58 }
 0x11b   : > { %v1245_v61 = vpop.permute.xlu0 %567  ;;  %v447_v62 = vpop.permute.xlu1 %446 }
 0x11f   : > { %v1247_v63 = vpop.permute.xlu0 %423  ;;  %v443_v0 = vpop.permute.xlu1 %442 }
 0x123   : > { %v1249_v1 = vpop.permute.xlu0 %400  ;;  %v1251_v2 = vpop.permute.xlu1 %469 }
 0x127   : > { %v497_v3 = vpop.permute.xlu0 %496  ;;  %v1253_v4 = vpop.permute.xlu1 %467 }
 0x128   : > { %v506_v5 = vsel %vm504_vm2, %v495_v58, %v497_v3  ;;  %v433_v58 = vsel %vm429_vm10, %v1243_v59, %v1237_v54  ;;  %v480_v3 = vsel %vm479_vm5, %v1253_v4, %v1251_v2 }
 0x129   : > { %942 = vmatprep.subr.msk.mxu0 %vm1213_vm3, %v506_v5  ;;  %968 = vmatprep.subr.msk.mxu1 %vm1213_vm3, %v506_v5 }
 0x12a   : > { %943 = vmatpush1.msk.msra.mxu0 %vm1223_vm4, %v505_v6  ;;  %982 = vmatpush1.msk.msra.mxu1 %vm1223_vm4, %v505_v6 }
 0x12b   : > { %v445_v7 = vpop.permute.xlu0 %444  ;;  %v422_v8 = vpop.permute.xlu1 %421 }
 0x12c   : > { %v456_v23 = vsel %vm454_vm6, %v445_v7, %v447_v62  ;;  %v455_v24 = vsel %vm454_vm6, %v443_v0, %v445_v7  ;;  %v588_v62 = vrot.slane %v465_v44, 4  ;;  %v432_v0 = vsel %vm429_vm10, %v1247_v63, %v1243_v59  ;;  %v625_v44 = vld [vmem:[%s1425_s3] sm:$0xff] }
 0x12d   : > { %v464_v31 = vsel %vm1213_vm3, %v456_v23, 0.0  ;;  %v463_v38 = vsel %vm1223_vm4, %v455_v24, 0.0  ;;  %v577_v63 = vsel %vm573_vm11, %v1241_v57, %v1235_v52 }
 0x12e   : > { %v587_v45 = vrot.slane %v464_v31, 4  ;;  %v586_v48 = vrot.slane %v463_v38, 4 }
 0x12f   : > { %v472_v9 = vpop.permute.xlu0 %471  ;;  %v418_v11 = vpop.permute.xlu1 %417 }
 0x130   : > { %v481_v60 = vsel %vm479_vm5, %v1251_v2, %v472_v9  ;;  %v591_v59 = vsel %vm319_vm0, %v587_v45, %v590_v55  ;;  %v441_v2 = vsel %vm1278_vm9, %v433_v58, 0.0  ;;  %v589_v7 = vsel %vm319_vm0, %v586_v48, %v588_v62 }
 0x131   : > { %v440_v9 = vsel %vm1271_vm8, %v432_v0, 0.0  ;;  %v622_v52 = vsel %vm319_vm0, %v577_v63, %v587_v45 }
 0x133   : > { %v420_v13 = vpop.permute.xlu0 %419  ;;  %v1265_v14 = vpop.permute.xlu1 %563 }
 0x134   : > { %v431_v46 = vsel %vm429_vm10, %v420_v13, %v422_v8  ;;  %v430_v49 = vsel %vm429_vm10, %v418_v11, %v420_v13  ;;  %v576_v8 = vsel %vm573_vm11, %v1245_v61, %v1241_v57  ;;  %v408_v57 = vsel %vm404_vm12, %v1249_v1, %v1239_v56 }
 0x135   : > { %v439_v5 = vsel %vm1278_vm9, %v431_v46, 0.0  ;;  %v438_v54 = vsel %vm1271_vm8, %v430_v49, 0.0 }
 0x136   : > { %v552_v11 = vrot.slane %v439_v5, 4  ;;  %v551_v13 = vrot.slane %v438_v54, 4 }
 0x137   : > { %v1267_v17 = vpop.permute.xlu0 %565  ;;  %v1269_v18 = vpop.permute.xlu1 %561 }
 0x138   : > { %v575_v61 = vsel %vm573_vm11, %v1265_v14, %v1267_v17  ;;  %v574_v26 = vsel %vm573_vm11, %v1269_v18, %v1265_v14 }
 0x13b   : > { %v601_v19 = vpop.permute.xlu0 %600  ;;  %v599_v20 = vpop.permute.xlu1 %598 }
 0x13c   : > { %v610_v32 = vsel %vm608_vm7, %v599_v20, %v601_v19 }
 0x13d   : > { %v624_v47 = vsel %vm319_vm0, %v491_v35, %v610_v32 }
 0x13f   : > { %v597_v21 = vpop.permute.xlu0 %596  ;;  %v607_v22 = vpop.permute.xlu1 %606 }
 0x140   : > { %v609_v39 = vsel %vm608_vm7, %v597_v21, %v599_v20  ;;  %v621_v20 = vsel %vm319_vm0, %v576_v8, %v586_v48  ;;  %v555_v21 = vrot.slane %v441_v2, 4 }
 0x141   : > { %v623_v53 = vsel %vm319_vm0, %v490_v36, %v609_v39  ;;  %v382_v36 = vsel %vm1271_vm8, %v1130_v12, 0.0  ;;  %v626_v12 = vld [vmem:[%s1425_s3 + $0x8] sm:$0xff] }
 0x142   : > { %v556_v56 = vsel %vm319_vm0, %v552_v11, %v555_v21 }
 0x143   : > { %v605_v33 = vpop.permute.xlu0 %604  ;;  %v603_v34 = vpop.permute.xlu1 %602 }
 0x144   : > { %v612_v40 = vsel %vm608_vm7, %v605_v33, %v607_v22  ;;  %v611_v41 = vsel %vm608_vm7, %v603_v34, %v605_v33  ;;  %v553_v22 = vrot.slane %v440_v9, 4 }
 0x145   : > { %680 = vmatprep.subr.mxu0 %v612_v40  ;;  %969 = vmatprep.subr.mxu1 %v612_v40 }
 0x146   : > { %681 = vmatpush1.msra.mxu0 %v611_v41  ;;  %983 = vmatpush1.msra.mxu1 %v611_v41  ;;  %v554_v17 = vsel %vm319_vm0, %v551_v13, %v553_v22 }
 0x147   : > { %v399_v50 = vpop.permute.xlu0 %398  ;;  %682 = vmatprep.subr.mxu0 %v624_v47  ;;  %970 = vmatprep.subr.mxu1 %v624_v47  ;;  %v1298_v51 = vpop.permute.xlu1 %394 }
 0x148   : > { %683 = vmatpush1.msra.mxu0 %v623_v53  ;;  %984 = vmatpush1.msra.mxu1 %v623_v53  ;;  %v407_v19 = vsel %vm404_vm12, %v399_v50, %v1249_v1  ;;  %v416_v1 = vsel %vm1213_vm3, %v408_v57, 0.0 }
 0x149   : > { %944 = vmatprep.subr.msk.mxu0 %vm1278_vm9, %v481_v60  ;;  %971 = vmatprep.subr.msk.mxu1 %vm1278_vm9, %v481_v60  ;;  %v415_v28 = vsel %vm1223_vm4, %v407_v19, 0.0  ;;  %v620_v30 = vsel %vm319_vm0, %v416_v1, %v552_v11 }
 0x14a   : > { %945 = vmatpush1.msk.msra.mxu0 %vm1271_vm8, %v480_v3  ;;  %985 = vmatpush1.msk.msra.mxu1 %vm1271_vm8, %v480_v3  ;;  %v619_v31 = vsel %vm319_vm0, %v415_v28, %v551_v13 }
 0x14b   : > { %v397_v4 = vpop.permute.xlu0 %396  ;;  %686 = vmatprep.subr.mxu0 %v591_v59  ;;  %972 = vmatprep.subr.mxu1 %v591_v59  ;;  %v393_v6 = vpop.permute.xlu1 %392 }
 0x14c   : > { %687 = vmatpush1.msra.mxu0 %v589_v7  ;;  %986 = vmatpush1.msra.mxu1 %v589_v7  ;;  %v406_v32 = vsel %vm404_vm12, %v1298_v51, %v397_v4  ;;  %v405_v33 = vsel %vm404_vm12, %v393_v6, %v1298_v51 }
 0x14d   : > { %688 = vmatprep.subr.mxu0 %v622_v52  ;;  %973 = vmatprep.subr.mxu1 %v622_v52 }
 0x14e   : > { %689 = vmatpush1.msra.mxu0 %v621_v20  ;;  %987 = vmatpush1.msra.mxu1 %v621_v20 }
 0x14f   : > { %v529_v23 = vpop.permute.xlu0 %528  ;;  %690 = vmatprep.subr.mxu0 %v575_v61  ;;  %974 = vmatprep.subr.mxu1 %v575_v61  ;;  %v531_v24 = vpop.permute.xlu1 %530 }
 0x150   : > { %691 = vmatpush1.msra.mxu0 %v574_v26  ;;  %988 = vmatpush1.msra.mxu1 %v574_v26  ;;  %v540_v34 = vsel %vm538_vm13, %v529_v23, %v531_v24  ;;  %v308_v24 = vld [vmem:[%s294_s12] sm:$0xff] }
 0x151   : > { %692 = vmatprep.subr.mxu0 %v556_v56  ;;  %975 = vmatprep.subr.mxu1 %v556_v56  ;;  %v618_v43 = vsel %vm319_vm0, %v383_v37, %v540_v34  ;;  %v309_v56 = vld [vmem:[%s294_s12 + $0x8] sm:$0xff] }
 0x152   : > { %693 = vmatpush1.msra.mxu0 %v554_v17  ;;  %989 = vmatpush1.msra.mxu1 %v554_v17 }
 0x153   : > { %v535_v14 = vpop.permute.xlu0 %534  ;;  %694 = vmatprep.subr.mxu0 %v620_v30  ;;  %976 = vmatprep.subr.mxu1 %v620_v30  ;;  %v537_v18 = vpop.permute.xlu1 %536 }
 0x154   : > { %695 = vmatpush1.msra.mxu0 %v619_v31  ;;  %990 = vmatpush1.msra.mxu1 %v619_v31  ;;  %v542_v38 = vsel %vm538_vm13, %v535_v14, %v537_v18 }
 0x155   : > { %946 = vmatprep.subr.msk.mxu0 %vm1213_vm3, %v406_v32  ;;  %977 = vmatprep.subr.msk.mxu1 %vm1213_vm3, %v406_v32 }
 0x156   : > { %947 = vmatpush1.msk.msra.mxu0 %vm1223_vm4, %v405_v33  ;;  %991 = vmatpush1.msk.msra.mxu1 %vm1223_vm4, %v405_v33 }
 0x157   : > { %v533_v39 = vpop.permute.xlu0 %532  ;;  %698 = vmatprep.subr.mxu0 %v542_v38  ;;  %978 = vmatprep.subr.mxu1 %v542_v38  ;;  %v527_v40 = vpop.permute.xlu1 %526 }
 0x158   : > { %v539_v41 = vsel %vm538_vm13, %v527_v40, %v529_v23  ;;  %v541_v35 = vsel %vm538_vm13, %v533_v39, %v535_v14 }
 0x159   : > { %699 = vmatpush1.msra.mxu0 %v541_v35  ;;  %992 = vmatpush1.msra.mxu1 %v541_v35  ;;  %v617_v42 = vsel %vm319_vm0, %v382_v36, %v539_v41 }
 0x15a   : > { %700 = vmatprep.subr.mxu0 %v618_v43  ;;  %979 = vmatprep.subr.mxu1 %v618_v43 }
 0x15b   : > { %701 = vmatpush1.msra.mxu0 %v617_v42  ;;  %993 = vmatpush1.msra.mxu1 %v617_v42 }
 0x15c   : > { %948 = vmatprep.subr.msk.mxu0 %vm1278_vm9, %v1144_v15  ;;  %980 = vmatprep.subr.msk.mxu1 %vm1278_vm9, %v1144_v15  ;;  %v628_v15 = vld [vmem:[%s1425_s3 + $0x18] sm:$0xff] }
 0x15d   : > { %949 = vmatpush1.msk.msra.mxu0 %vm1271_vm8, %v1151_v16  ;;  %994 = vmatpush1.msk.msra.mxu1 %vm1271_vm8, %v1151_v16 }
 0x15e   : > { %950 = vmatmul.mubr.msk.f32.vlgmr.msra.gmra.mxu0 %vm653_vm14, %v625_v44  ;;  %952 = vmatmul.mubr.msk.f32.vlgmr.msra.gmra.mxu1 %vm653_vm14, %v627_v10 }
 0x15f   : > { %742 = vmatprep.mubr.f32.mxu0 %v1066_v27  ;;  %754 = vmatprep.mubr.f32.mxu1 %v1066_v27 }
 0x162   : > { %951 = vmatmul.mubr.msk.f32.gmra.mxu0 %vm653_vm14, %v626_v12  ;;  %953 = vmatmul.mubr.msk.f32.gmra.mxu1 %vm653_vm14, %v628_v15 }
 0x164   : > { %v636_v29 = vpop.permute.xlu0 %635  ;;  %v641_v50 = vpop.permute.xlu1 %640 }
 0x168   : > { %v651_v3 = vpop.permute.xlu0 %650  ;;  %v646_v59 = vpop.permute.xlu1 %645 }
 0x21e   : > { %v738_v45 = vpop.f32.mrf.mxu0  ;;  %v750_v25 = vpop.f32.mrf.mxu1 }
 0x21f   : > { %v739_v16 = vadd.f32 %v738_v45, %v636_v29  ;;  %v751_v2 = vadd.f32 %v750_v25, %v646_v59 }
 0x220   : > { %v740_v46 = vpop.f32.mrf.mxu0  ;;  %v752_v49 = vpop.f32.mrf.mxu1 }
 0x221   : > { %v954_v47 = vmul.f32 -1.442695, %v739_v16  ;;  %v741_v48 = vadd.f32 %v740_v46, %v636_v29  ;;  %v753_v13 = vadd.f32 %v752_v49, %v646_v59 }
 0x222   : > { %v744_v27 = vpop.f32.mrf.mxu0  ;;  %v756_v60 = vpop.f32.mrf.mxu1 }
 0x223   : > { %1017 = vpow2.f32 %v954_v47  ;;  %v955_v51 = vmul.f32 -1.442695, %v741_v48  ;;  %v745_v53 = vadd.f32 %v744_v27, %v641_v50  ;;  %v757_v54 = vadd.f32 %v756_v60, %v651_v3 }
 0x224   : > { %v746_v55 = vpop.f32.mrf.mxu0  ;;  %v758_v5 = vpop.f32.mrf.mxu1 }
 0x225   : > { %1019 = vpow2.f32 %v955_v51  ;;  %v956_v58 = vmul.f32 -1.442695, %v745_v53  ;;  %v747_v62 = vadd.f32 %v746_v55, %v641_v50  ;;  %v759_v63 = vadd.f32 %v758_v5, %v651_v3 }
 0x226   : > { %v958_v4 = vmul.f32 -1.442695, %v757_v54 }
 0x227   : > { %1021 = vpow2.f32 %v956_v58  ;;  %v957_v0 = vmul.f32 -1.442695, %v747_v62  ;;  %v959_v7 = vmul.f32 -1.442695, %v759_v63 }
 0x229   : > { %1023 = vpow2.f32 %v957_v0 }
 0x22a   : > { %1025 = vtanh.f32 %v751_v2 }
 0x22b   : > { %1027 = vpow2.f32 %v958_v4 }
 0x22c   : > { %1029 = vpow2.f32 %v959_v7 }
 0x230   : > { %v1018_v6 = vpop.eup %1017 }
 0x231   : > { %v767_v8 = vadd.f32 1.0, %v1018_v6 }
 0x232   : > { %v1020_v9 = vpop.eup %1019 }
 0x233   : > { %v768_v11 = vadd.f32 1.0, %v1020_v9  ;;  %1031 = vrcp.f32 %v767_v8 }
 0x234   : > { %v1022_v52 = vpop.eup %1021 }
 0x235   : > { %v779_v19 = vadd.f32 1.0, %v1022_v52  ;;  %1033 = vrcp.f32 %v768_v11 }
 0x236   : > { %v1024_v20 = vpop.eup %1023 }
 0x237   : > { %1035 = vrcp.f32 %v779_v19  ;;  %v780_v21 = vadd.f32 1.0, %v1024_v20  ;;  %v1026_v57 = vpop.eup %1025 }
 0x238   : > { %1037 = vtanh.f32 %v753_v13  ;;  %v1028_v61 = vpop.eup %1027 }
 0x239   : > { %1039 = vrcp.f32 %v780_v21  ;;  %v1030_v22 = vpop.eup %1029  ;;  %v793_v1 = vadd.f32 1.0, %v1028_v61 }
 0x23a   : > { %v794_v31 = vadd.f32 1.0, %v1030_v22 }
 0x23b   : > { %1041 = vrcp.f32 %v793_v1 }
 0x240   : > { %v1032_v23 = vpop.eup %1031 }
 0x241   : > { %v801_v14 = vmul.f32 %v1032_v23, %v1026_v57 }
 0x242   : > { %v1034_v26 = vpop.eup %1033 }
 0x244   : > { %v1036_v28 = vpop.eup %1035 }
 0x245   : > { %v1038_v17 = vpop.eup %1037  ;;  %v799_v30 = vmul.f32 %v1036_v28, %v308_v24 }
 0x246   : > { %v1040_v18 = vpop.eup %1039  ;;  %v802_v33 = vmul.f32 %v1038_v17, %v1034_v26 }
 0x247   : > { %v800_v32 = vmul.f32 %v1040_v18, %v309_v56  ;;  %v803_v34 = vadd.f32 %v801_v14, %v799_v30 }
 0x248   : > { %v1042_v39 = vpop.eup %1041 }
 0x249   : > { %v804_v38 = vadd.f32 %v802_v33, %v800_v32  ;;  %1043 = vtanh.f32 %v803_v34  ;;  %809 = vst [vmem:[%s304_s15] sm:$0xff] %v803_v34 }
 0x24a   : > { %1045 = vrcp.f32 %v794_v31 }
 0x24b   : > { %1047 = vtanh.f32 %v804_v38  ;;  %810 = vst [vmem:[%s304_s15 + $0x8] sm:$0xff] %v804_v38 }
 0x256   : > { %v1044_v40 = vpop.eup %1043 }
 0x257   : > { %v1046_v41 = vpop.eup %1045  ;;  %v807_v35 = vmul.f32 %v1044_v40, %v1042_v39 }
 0x258   : > { %v1048_v37 = vpop.eup %1047 }
 0x259   : > { %v808_v36 = vmul.f32 %v1048_v37, %v1046_v41  ;;  %811 = vst [vmem:[%s299_s18] sm:$0xff] %v807_v35 }
 0x25b   : > { %812 = vst [vmem:[%s299_s18 + $0x8] sm:$0xff] %v808_v36 }
 0x25c PF: > { %s17_s21 = sadd.s32 1, %s1055_s21  }
 0x25d   : > { %p14_p4 = scmp.ge.s32.totalorder %s17_s21, 4  }
 0x25f   :  { %16 = sbr.rel (!%p14_p4) target bundleno = 1 (0x1), region = 88 }

</bundles_post_ra>
